<compile_context>
chip_gen: v5e
topology: v5e:2x2
jax: 0.10.0
libtpu: 0.0.40
codegen_flags: <defaults>
</compile_context>

<pallas_src>
import functools

import jax
import jax.numpy as jnp
from jax.experimental import pallas as pl
from jax.experimental.pallas import tpu as pltpu


def _round_up(v: int, m: int) -> int:
    return (v + m - 1) // m * m


def f2_kernel(x_ref, w0_ref, b0_ref, w1_ref, b1_ref, w2_ref, b2_ref, o_ref):
    """One batch tile: fused 3x (matmul + bias) with 2 ReLUs, f32 accumulation."""
    cdt = w0_ref.dtype                     # compute dtype (f32 or bf16)
    x = x_ref[...].astype(cdt)

    # Layer 0: relu(x @ W0p + b0)          (W0p = padded W0^T, prepared at init)
    h = jnp.dot(x, w0_ref[...], preferred_element_type=jnp.float32)
    h = jnp.maximum(h + b0_ref[...], 0.0)

    # Layer 1: relu(h @ W1p + b1)
    h = jnp.dot(h.astype(cdt), w1_ref[...], preferred_element_type=jnp.float32)
    h = jnp.maximum(h + b1_ref[...], 0.0)

    # Layer 2: logits = h @ W2p + b2       (true k columns, no padding, no slice)
    out = jnp.dot(h.astype(cdt), w2_ref[...], preferred_element_type=jnp.float32)
    o_ref[...] = (out + b2_ref[...]).astype(o_ref.dtype)


def prepare_f2_params(w0, b0, w1, b1, w2, b2, *, compute_dtype=jnp.bfloat16):
    """One-time parameter preprocessing (do this at init, NOT per forward call).

    - Transposes weights so the kernel does plain lane-dense x @ W.
    - Zero-pads the HIDDEN dims up to multiples of 128 lanes (zeros are
      numerically inert: padded activations are relu(0 + 0) = 0).  The final
      output dim k is left at its true width so the logits writeback is not
      inflated and no slicing is needed afterwards.
    - compute_dtype=bf16 is recommended on v5e/v6e/v7x (MXU-native); the bias
      add happens on the f32 accumulator so results stay within bf16 rounding
      of the module.  Pass jnp.float32 for a bit-faithful path.
    """
    h0, d = w0.shape
    h1 = w1.shape[0]
    k = w2.shape[0]
    H0, H1 = _round_up(h0, 128), _round_up(h1, 128)

    w0p = jnp.zeros((d, H0), compute_dtype).at[:, :h0].set(w0.T.astype(compute_dtype))
    w1p = jnp.zeros((H0, H1), compute_dtype).at[:h0, :h1].set(w1.T.astype(compute_dtype))
    w2p = jnp.zeros((H1, k), compute_dtype).at[:h1, :].set(w2.T.astype(compute_dtype))
    b0p = jnp.zeros((1, H0), jnp.float32).at[:, :h0].set(b0.astype(jnp.float32))
    b1p = jnp.zeros((1, H1), jnp.float32).at[:, :h1].set(b1.astype(jnp.float32))
    b2p = b2.reshape(1, k).astype(jnp.float32)
    return (w0p, b0p, w1p, b1p, w2p, b2p)


def _pick_tile(n: int, block_rows: int) -> int:
    """Batch tile size: as large as allowed, but keep >=2 grid steps when the
    batch is big enough so the 'parallel' axis can split across v7x's 2 TCs."""
    tm = min(block_rows, n)
    if pl.cdiv(n, tm) < 2 and n >= 512:
        tm = _round_up(pl.cdiv(n, 2), 256)
    return max(tm, 1)


@functools.partial(jax.jit, static_argnames=("block_rows",))
def f2_forward(x, params, *, block_rows: int = 512):
    """x: (n, d) f32 or bf16; params from prepare_f2_params. Returns (n, k) f32."""
    w0p, b0p, w1p, b1p, w2p, b2p = params
    n, d = x.shape
    H0, H1, k = w0p.shape[1], w1p.shape[1], w2p.shape[1]

    tm = _pick_tile(n, block_rows)
    grid = (pl.cdiv(n, tm),)

    # VMEM budget: double-buffered x/out tiles + resident weights + headroom,
    # clamped well under v7x's 64 MiB physical VMEM (fine on v5e/v6e too).
    weight_bytes = sum(a.size * a.dtype.itemsize for a in (w0p, b0p, w1p, b1p, w2p, b2p))
    tile_bytes = 2 * (tm * d * x.dtype.itemsize + tm * k * 4) + 2 * tm * max(H0, H1) * 4
    vmem_limit = int(min(48 * 2**20, max(24 * 2**20, 2 * (2 * weight_bytes + tile_bytes))))

    # Advisory cost estimate: the matmul dims the kernel actually performs
    # (padded hidden widths, true k) and the true bytes moved (no padded logits).
    flops = 2 * n * (d * H0 + H0 * H1 + H1 * k)
    bytes_accessed = x.size * x.dtype.itemsize + weight_bytes + n * k * 4

    return pl.pallas_call(
        f2_kernel,
        out_shape=jax.ShapeDtypeStruct((n, k), jnp.float32),
        grid=grid,
        in_specs=[
            # Batch tile of x walks the grid (double-buffered DMA overlaps compute).
            pl.BlockSpec((tm, d), lambda i: (i, 0)),
            # Weights / biases: constant block index -> resident in VMEM, no re-DMA.
            pl.BlockSpec((d, H0), lambda i: (0, 0)),
            pl.BlockSpec((1, H0), lambda i: (0, 0)),
            pl.BlockSpec((H0, H1), lambda i: (0, 0)),
            pl.BlockSpec((1, H1), lambda i: (0, 0)),
            pl.BlockSpec((H1, k), lambda i: (0, 0)),
            pl.BlockSpec((1, k), lambda i: (0, 0)),
        ],
        # Unpadded (tm, k) output tile: masked vst on the tiny lane remainder is
        # far cheaper than 8x padded writeback + a wrapper slice pass.
        out_specs=pl.BlockSpec((tm, k), lambda i: (i, 0)),
        compiler_params=pltpu.CompilerParams(
            dimension_semantics=("parallel",),          # megacore / dual-TC on v7x
            vmem_limit_bytes=vmem_limit,
        ),
        cost_estimate=pl.CostEstimate(
            flops=flops, transcendentals=0, bytes_accessed=bytes_accessed
        ),
    )(x, w0p, b0p, w1p, b1p, w2p, b2p)


def reference_forward(x, w0, b0, w1, b1, w2, b2):
    h = jnp.maximum(x @ w0.T + b0, 0.0)
    h = jnp.maximum(h @ w1.T + b1, 0.0)
    return h @ w2.T + b2


if __name__ == "__main__":
    # Small shapes consistent with the module: (n, d) input, 3 linear layers.
    # n = 512 exercises the batch grid (it is split into two 256-row tiles).
    n, d, h0, h1, k = 512, 32, 64, 32, 16

    key = jax.random.PRNGKey(0)
    kx, k0, k1, k2, kb0, kb1, kb2 = jax.random.split(key, 7)

    x = jax.random.normal(kx, (n, d), dtype=jnp.float32)
    # Deterministic "randn" init, same shapes as the PyTorch Parameters.
    w0 = jax.random.normal(k0, (h0, d), dtype=jnp.float32)
    w1 = jax.random.normal(k1, (h1, h0), dtype=jnp.float32)
    w2 = jax.random.normal(k2, (k, h1), dtype=jnp.float32)
    b0 = jax.random.normal(kb0, (1, h0), dtype=jnp.float32)
    b1 = jax.random.normal(kb1, (1, h1), dtype=jnp.float32)
    b2 = jax.random.normal(kb2, (1, k), dtype=jnp.float32)

    ref = reference_forward(x, w0, b0, w1, b1, w2, b2)

    # f32 path: faithful to the module's semantics (tight tolerance).
    params_f32 = prepare_f2_params(w0, b0, w1, b1, w2, b2, compute_dtype=jnp.float32)
    out = jax.block_until_ready(f2_forward(x, params_f32, block_rows=512))
    assert out.shape == (n, k)
    assert jnp.allclose(out, ref, atol=1e-4, rtol=1e-4)

    # bf16-operand path (recommended on v5e/v6e/v7x), bf16 x at the boundary,
    # f32 accumulation; loose relative check.
    params_bf16 = prepare_f2_params(w0, b0, w1, b1, w2, b2, compute_dtype=jnp.bfloat16)
    out_bf16 = jax.block_until_ready(
        f2_forward(x.astype(jnp.bfloat16), params_bf16, block_rows=512)
    )
    rel_err = float(jnp.max(jnp.abs(out_bf16 - ref)) / jnp.max(jnp.abs(ref)))
    assert out_bf16.shape == (n, k)
    assert rel_err < 0.25

    print("KERNEL_OK")
</pallas_src>

<mosaic_0001>
module attributes {stable_mosaic.version = 11 : i64} {
  func.func @f2_kernel(%arg0: i32, %arg1: memref<256x32xf32, #tpu.memory_space<vmem>>, %arg2: memref<32x128xf32, #tpu.memory_space<vmem>>, %arg3: memref<1x128xf32, #tpu.memory_space<vmem>>, %arg4: memref<128x128xf32, #tpu.memory_space<vmem>>, %arg5: memref<1x128xf32, #tpu.memory_space<vmem>>, %arg6: memref<128x16xf32, #tpu.memory_space<vmem>>, %arg7: memref<1x16xf32, #tpu.memory_space<vmem>>, %arg8: memref<256x16xf32, #tpu.memory_space<vmem>>) attributes {dimension_semantics = [#tpu.dimension_semantics<parallel>], iteration_bounds = array<i64: 2>, scalar_prefetch = 0 : i64, scratch_operands = 0 : i64, tpu.core_type = #tpu.core_type<tc>, window_params = [{transform_indices = @transform_0, window_bounds = array<i64: 256, 32>}, {pipeline_mode = #tpu.pipeline_mode<synchronous>, transform_indices = @transform_1, window_bounds = array<i64: 32, 128>}, {pipeline_mode = #tpu.pipeline_mode<synchronous>, transform_indices = @transform_2, window_bounds = array<i64: 1, 128>}, {pipeline_mode = #tpu.pipeline_mode<synchronous>, transform_indices = @transform_3, window_bounds = array<i64: 128, 128>}, {pipeline_mode = #tpu.pipeline_mode<synchronous>, transform_indices = @transform_4, window_bounds = array<i64: 1, 128>}, {pipeline_mode = #tpu.pipeline_mode<synchronous>, transform_indices = @transform_5, window_bounds = array<i64: 128, 16>}, {pipeline_mode = #tpu.pipeline_mode<synchronous>, transform_indices = @transform_6, window_bounds = array<i64: 1, 16>}, {transform_indices = @transform_7, window_bounds = array<i64: 256, 16>}]} {
    %c0 = arith.constant 0 : index
    %c0_0 = arith.constant 0 : index
    %0 = vector.load %arg1[%c0, %c0_0] : memref<256x32xf32, #tpu.memory_space<vmem>>, vector<256x32xf32>
    %c0_1 = arith.constant 0 : index
    %c0_2 = arith.constant 0 : index
    %1 = vector.load %arg2[%c0_1, %c0_2] : memref<32x128xf32, #tpu.memory_space<vmem>>, vector<32x128xf32>
    %cst = arith.constant dense<0.000000e+00> : vector<256x128xf32>
    %2 = tpu.matmul %0, %1, %cst {dimension_numbers = #tpu.dot_dimension_numbers<[1], [0], [0], [1], [0, 0, 1, 1], [], []>} : vector<256x32xf32>, vector<32x128xf32>, vector<256x128xf32> -> vector<256x128xf32>
    %c0_3 = arith.constant 0 : index
    %c0_4 = arith.constant 0 : index
    %3 = vector.load %arg3[%c0_3, %c0_4] : memref<1x128xf32, #tpu.memory_space<vmem>>, vector<1x128xf32>
    %4 = vector.broadcast %3 : vector<1x128xf32> to vector<256x128xf32>
    %5 = arith.addf %2, %4 : vector<256x128xf32>
    %cst_5 = arith.constant 0.000000e+00 : f32
    %6 = vector.broadcast %cst_5 : f32 to vector<256x128xf32>
    %7 = arith.maximumf %5, %6 : vector<256x128xf32>
    %c0_6 = arith.constant 0 : index
    %c0_7 = arith.constant 0 : index
    %8 = vector.load %arg4[%c0_6, %c0_7] : memref<128x128xf32, #tpu.memory_space<vmem>>, vector<128x128xf32>
    %cst_8 = arith.constant dense<0.000000e+00> : vector<256x128xf32>
    %9 = tpu.matmul %7, %8, %cst_8 {dimension_numbers = #tpu.dot_dimension_numbers<[1], [0], [0], [1], [0, 0, 1, 1], [], []>} : vector<256x128xf32>, vector<128x128xf32>, vector<256x128xf32> -> vector<256x128xf32>
    %c0_9 = arith.constant 0 : index
    %c0_10 = arith.constant 0 : index
    %10 = vector.load %arg5[%c0_9, %c0_10] : memref<1x128xf32, #tpu.memory_space<vmem>>, vector<1x128xf32>
    %11 = vector.broadcast %10 : vector<1x128xf32> to vector<256x128xf32>
    %12 = arith.addf %9, %11 : vector<256x128xf32>
    %cst_11 = arith.constant 0.000000e+00 : f32
    %13 = vector.broadcast %cst_11 : f32 to vector<256x128xf32>
    %14 = arith.maximumf %12, %13 : vector<256x128xf32>
    %c0_12 = arith.constant 0 : index
    %c0_13 = arith.constant 0 : index
    %15 = vector.load %arg6[%c0_12, %c0_13] : memref<128x16xf32, #tpu.memory_space<vmem>>, vector<128x16xf32>
    %cst_14 = arith.constant dense<0.000000e+00> : vector<256x16xf32>
    %16 = tpu.matmul %14, %15, %cst_14 {dimension_numbers = #tpu.dot_dimension_numbers<[1], [0], [0], [1], [0, 0, 1, 1], [], []>} : vector<256x128xf32>, vector<128x16xf32>, vector<256x16xf32> -> vector<256x16xf32>
    %c0_15 = arith.constant 0 : index
    %c0_16 = arith.constant 0 : index
    %17 = vector.load %arg7[%c0_15, %c0_16] : memref<1x16xf32, #tpu.memory_space<vmem>>, vector<1x16xf32>
    %18 = vector.broadcast %17 : vector<1x16xf32> to vector<256x16xf32>
    %19 = arith.addf %16, %18 : vector<256x16xf32>
    %c0_17 = arith.constant 0 : index
    %c0_18 = arith.constant 0 : index
    %20 = vector.load %arg8[%c0_17, %c0_18] : memref<256x16xf32, #tpu.memory_space<vmem>>, vector<256x16xf32>
    tpu.vector_store %arg8[%c0_17, %c0_18], %19 {strides = array<i32>} : memref<256x16xf32, #tpu.memory_space<vmem>>, vector<256x16xf32>,
    return
  }
  func.func @transform_0(%arg0: i32) -> (i32, i32) {
    %c0_i32 = arith.constant 0 : i32
    %c0_i32_0 = arith.constant 0 : i32
    return %arg0, %c0_i32 : i32, i32
  }
  func.func @transform_1(%arg0: i32) -> (i32, i32) {
    %c0_i32 = arith.constant 0 : i32
    %c0_i32_0 = arith.constant 0 : i32
    %c0_i32_1 = arith.constant 0 : i32
    return %c0_i32, %c0_i32_0 : i32, i32
  }
  func.func @transform_2(%arg0: i32) -> (i32, i32) {
    %c0_i32 = arith.constant 0 : i32
    %c0_i32_0 = arith.constant 0 : i32
    %c0_i32_1 = arith.constant 0 : i32
    return %c0_i32, %c0_i32_0 : i32, i32
  }
  func.func @transform_3(%arg0: i32) -> (i32, i32) {
    %c0_i32 = arith.constant 0 : i32
    %c0_i32_0 = arith.constant 0 : i32
    %c0_i32_1 = arith.constant 0 : i32
    return %c0_i32, %c0_i32_0 : i32, i32
  }
  func.func @transform_4(%arg0: i32) -> (i32, i32) {
    %c0_i32 = arith.constant 0 : i32
    %c0_i32_0 = arith.constant 0 : i32
    %c0_i32_1 = arith.constant 0 : i32
    return %c0_i32, %c0_i32_0 : i32, i32
  }
  func.func @transform_5(%arg0: i32) -> (i32, i32) {
    %c0_i32 = arith.constant 0 : i32
    %c0_i32_0 = arith.constant 0 : i32
    %c0_i32_1 = arith.constant 0 : i32
    return %c0_i32, %c0_i32_0 : i32, i32
  }
  func.func @transform_6(%arg0: i32) -> (i32, i32) {
    %c0_i32 = arith.constant 0 : i32
    %c0_i32_0 = arith.constant 0 : i32
    %c0_i32_1 = arith.constant 0 : i32
    return %c0_i32, %c0_i32_0 : i32, i32
  }
  func.func @transform_7(%arg0: i32) -> (i32, i32) {
    %c0_i32 = arith.constant 0 : i32
    %c0_i32_0 = arith.constant 0 : i32
    return %arg0, %c0_i32 : i32, i32
  }
}

</mosaic_0001>

<bundles_post_ra>
// kernel: f2_forward.1
= control target key start
LH: loop header
LB: loop body
LE: loop exit
PB: predicated region body
PF: predicated region fallthrough
CT: control target
= control target key end

     0   :  { %s1089_s24 = smov 0   ;;  %s1464_s0 = inlined_call_operand.vmem [shape: f32[512,32], index: 0, kind: input, shape index: {}]   ;;  %s1465_s1 = inlined_call_operand.vmem [shape: f32[32,128], index: 1, kind: input, shape index: {}]   ;;  %s1466_s2 = inlined_call_operand.vmem [shape: f32[1,128], index: 2, kind: input, shape index: {}]   ;;  %s1467_s3 = inlined_call_operand.vmem [shape: f32[128,128], index: 3, kind: input, shape index: {}]   ;;  %s1468_s4 = inlined_call_operand.vmem [shape: f32[1,128], index: 4, kind: input, shape index: {}]   ;;  %s1469_s5 = inlined_call_operand.vmem [shape: f32[128,16], index: 5, kind: input, shape index: {}]   ;;  %s1470_s6 = inlined_call_operand.vmem [shape: f32[1,16], index: 6, kind: input, shape index: {}]   ;;  %s1471_s7 = inlined_call_operand.vmem [shape: f32[512,16], index: 7, kind: output, shape index: {}]  }
   0x1 LB: > { %s951_s25 = sadd.s32 4294967295, %s1047_s24   ;;  %p955_p0 = scmp.ge.s32.totalorder %s1047_s24, 1  ;;  %s1047_s24 = sphi %s1089_s24, %s17_s24  }
   0x2   : > { %p238_p1 = scmp.lt.s32.totalorder %s1047_s24, 3 }
   0x4   : > { %p239_p2 = pnand %p955_p0, %p238_p1 }
   0x5   : > { %s956_s30 = sshll.u32 (!%p239_p2), %s951_s25, 5 }
   0x6   : > { %242 = sbr.rel (%p239_p2) target bundleno = 668 (0x29c), region = 48  ;;  %p271_p3 = scmp.lt.s32.totalorder (!%p239_p2), %s956_s30, 63 }
   0xb   : > { %v317_v0 = vld [vmem:[%s1465_s1 + $0x18] sm:$0xff]  ;;  %v316_v1 = vld [vmem:[%s1465_s1 + $0x10] sm:$0xff]  ;;  %v315_v2 = vld [vmem:[%s1465_s1 + $0x8] sm:$0xff]  ;;  %s1473_s30 = smov (!%p271_p3, %s956_s30), 63  ;;  %vm322_vm0 = vcmask 261120   ;;  %vm862_vm1 = vcmask 130048  }
   0xc   : > { %431 = vmatpush.msra.mxu0 %v317_v0  ;;  %994 = vmatpush.msra.mxu3 %v317_v0  ;;  %v314_v3 = vld [vmem:[%s1465_s1] sm:$0xff]  ;;  %s957_s12 = sshll.u32 %s1473_s30, 3  ;;  %v579_v13 = vld [vmem:[%s1467_s3 + $0x78] sm:$0xff]  ;;  %v578_v14 = vld [vmem:[%s1467_s3 + $0x70] sm:$0xff] }
   0xd   : > { %s1117_s15 = scalar_lea.vmem %s1464_s0, %s957_s12  ;;  %584 = vmatpush.msra.mxu1 %v579_v13  ;;  %v577_v15 = vld [vmem:[%s1467_s3 + $0x68] sm:$0xff]  ;;  %v576_v17 = vld [vmem:[%s1467_s3 + $0x60] sm:$0xff]  ;;  %v575_v18 = vld [vmem:[%s1467_s3 + $0x58] sm:$0xff] }
   0xe   : > { %432 = vmatpush.msra.mxu0 %v316_v1  ;;  %995 = vmatpush.msra.mxu3 %v316_v1  ;;  %v282_v4 = vld [vmem:[%s1117_s15] sm:$0xff]  ;;  %v283_v5 = vld [vmem:[%s1117_s15 + $0x8] sm:$0xff]  ;;  %v284_v6 = vld [vmem:[%s1117_s15 + $0x10] sm:$0xff] }
   0xf   : > { %v285_v7 = vld [vmem:[%s1117_s15 + $0x18] sm:$0xff]  ;;  %v286_v8 = vld [vmem:[%s1117_s15 + $0x20] sm:$0xff]  ;;  %v287_v9 = vld [vmem:[%s1117_s15 + $0x28] sm:$0xff]  ;;  %585 = vmatpush.msra.mxu1 %v578_v14 }
  0x10   : > { %433 = vmatpush.msra.mxu0 %v315_v2  ;;  %996 = vmatpush.msra.mxu3 %v315_v2  ;;  %v288_v10 = vld [vmem:[%s1117_s15 + $0x30] sm:$0xff]  ;;  %v289_v11 = vld [vmem:[%s1117_s15 + $0x38] sm:$0xff]  ;;  %v290_v12 = vld [vmem:[%s1117_s15 + $0x40] sm:$0xff] }
  0x11   : > { %v291_v16 = vld [vmem:[%s1117_s15 + $0x48] sm:$0xff]  ;;  %586 = vmatpush.msra.mxu1 %v577_v15  ;;  %v574_v19 = vld [vmem:[%s1467_s3 + $0x50] sm:$0xff]  ;;  %v572_v22 = vld [vmem:[%s1467_s3 + $0x40] sm:$0xff] }
  0x12   : > { %434 = vmatpush.msra.mxu0 %v314_v3  ;;  %997 = vmatpush.msra.mxu3 %v314_v3  ;;  %v573_v20 = vld [vmem:[%s1467_s3 + $0x48] sm:$0xff]  ;;  %v292_v21 = vld [vmem:[%s1117_s15 + $0x50] sm:$0xff]  ;;  %v571_v23 = vld [vmem:[%s1467_s3 + $0x38] sm:$0xff] }
  0x13   : > { %960 = vmatmul.msk.f32.vlgmr.msra.gmra.mxu0 %vm322_vm0, %v282_v4  ;;  %587 = vmatpush.msra.mxu1 %v576_v17  ;;  %v570_v24 = vld [vmem:[%s1467_s3 + $0x30] sm:$0xff]  ;;  %v569_v25 = vld [vmem:[%s1467_s3 + $0x28] sm:$0xff]  ;;  %v293_v26 = vld [vmem:[%s1117_s15 + $0x58] sm:$0xff] }
  0x14   : > { %998 = vmatpush.msrb.mxu3 %v579_v13  ;;  %v568_v27 = vld [vmem:[%s1467_s3 + $0x20] sm:$0xff]  ;;  %v567_v28 = vld [vmem:[%s1467_s3 + $0x18] sm:$0xff]  ;;  %v566_v29 = vld [vmem:[%s1467_s3 + $0x10] sm:$0xff] }
  0x15   : > { %588 = vmatpush.msra.mxu1 %v575_v18  ;;  %v294_v30 = vld [vmem:[%s1117_s15 + $0x60] sm:$0xff]  ;;  %v565_v31 = vld [vmem:[%s1467_s3 + $0x8] sm:$0xff]  ;;  %v296_v34 = vld [vmem:[%s1117_s15 + $0x70] sm:$0xff] }
  0x16   : > { %999 = vmatpush.msrb.mxu3 %v578_v14  ;;  %v564_v32 = vld [vmem:[%s1467_s3] sm:$0xff]  ;;  %v295_v33 = vld [vmem:[%s1117_s15 + $0x68] sm:$0xff]  ;;  %v297_v35 = vld [vmem:[%s1117_s15 + $0x78] sm:$0xff] }
  0x17   : > { %589 = vmatpush.msra.mxu1 %v574_v19  ;;  %v1202_v36 = vld [vmem:[%s1466_s2] ss:$0 sm:$0xff]  ;;  %v299_v42 = vld [vmem:[%s1117_s15 + $0x88] sm:$0xff]  ;;  %v300_v46 = vld [vmem:[%s1117_s15 + $0x90] sm:$0xff] }
  0x18   : > { %1000 = vmatpush.msrb.mxu3 %v577_v15  ;;  %v298_v38 = vld [vmem:[%s1117_s15 + $0x80] sm:$0xff]  ;;  %v301_v50 = vld [vmem:[%s1117_s15 + $0x98] sm:$0xff]  ;;  %v303_v58 = vld [vmem:[%s1117_s15 + $0xa8] sm:$0xff] }
  0x19   : > { %590 = vmatpush.msra.mxu1 %v573_v20  ;;  %v302_v54 = vld [vmem:[%s1117_s15 + $0xa0] sm:$0xff]  ;;  %v308_v61 = vld [vmem:[%s1117_s15 + $0xd0] sm:$0xff]  ;;  %v309_v2 = vld [vmem:[%s1117_s15 + $0xd8] sm:$0xff] }
  0x1a   : > { %1001 = vmatpush.msrb.mxu3 %v576_v17  ;;  %v304_v63 = vld [vmem:[%s1117_s15 + $0xb0] sm:$0xff]  ;;  %v305_v4 = vld [vmem:[%s1117_s15 + $0xb8] sm:$0xff]  ;;  %v307_v15 = vld [vmem:[%s1117_s15 + $0xc8] sm:$0xff] }
  0x1b   : > { %961 = vmatmul.msk.f32.gmra.mxu0 %vm322_vm0, %v283_v5  ;;  %591 = vmatpush.msra.mxu1 %v572_v22  ;;  %v744_v13 = vld [vmem:[%s1469_s5 + $0x78] sm:$0xff]  ;;  %v743_v17 = vld [vmem:[%s1469_s5 + $0x70] sm:$0xff] }
  0x1c   : > { %1002 = vmatpush.msrb.mxu3 %v575_v18  ;;  %749 = vmatpush.msra.mxu2 %v744_v13 }
  0x1d   : > { %592 = vmatpush.msra.mxu1 %v571_v23  ;;  %986 = vmatmul.msk.f32.vlgmr.msra.gmra.mxu3 %vm322_vm0, %v308_v61 }
  0x1e   : > { %1003 = vmatpush.msrb.mxu3 %v574_v19  ;;  %750 = vmatpush.msra.mxu2 %v743_v17  ;;  %v742_v19 = vld [vmem:[%s1469_s5 + $0x68] sm:$0xff] }
  0x1f   : > { %593 = vmatpush.msra.mxu1 %v570_v24 }
  0x20   : > { %1004 = vmatpush.msrb.mxu3 %v573_v20  ;;  %v312_v20 = vld [vmem:[%s1117_s15 + $0xf0] sm:$0xff]  ;;  %751 = vmatpush.msra.mxu2 %v742_v19 }
  0x21   : > { %594 = vmatpush.msra.mxu1 %v569_v25 }
  0x22   : > { %1005 = vmatpush.msrb.mxu3 %v572_v22  ;;  %v740_v22 = vld [vmem:[%s1469_s5 + $0x58] sm:$0xff] }
  0x23   : > { %962 = vmatmul.msk.f32.gmra.mxu0 %vm322_vm0, %v284_v6  ;;  %595 = vmatpush.msra.mxu1 %v568_v27 }
  0x24   : > { %1006 = vmatpush.msrb.mxu3 %v571_v23 }
  0x25   : > { %596 = vmatpush.msra.mxu1 %v567_v28  ;;  %987 = vmatmul.msk.f32.gmra.mxu3 %vm322_vm0, %v309_v2 }
  0x26   : > { %1007 = vmatpush.msrb.mxu3 %v570_v24 }
  0x27   : > { %597 = vmatpush.msra.mxu1 %v566_v29 }
  0x28   : > { %1008 = vmatpush.msrb.mxu3 %v569_v25  ;;  %v739_v25 = vld [vmem:[%s1469_s5 + $0x50] sm:$0xff] }
  0x29   : > { %598 = vmatpush.msra.mxu1 %v565_v31 }
  0x2a   : > { %1009 = vmatpush.msrb.mxu3 %v568_v27  ;;  %v738_v27 = vld [vmem:[%s1469_s5 + $0x48] sm:$0xff] }
  0x2b   : > { %963 = vmatmul.msk.f32.gmra.mxu0 %vm322_vm0, %v285_v7  ;;  %599 = vmatpush.msra.mxu1 %v564_v32  ;;  %v310_v7 = vld [vmem:[%s1117_s15 + $0xe0] sm:$0xff] }
  0x2c   : > { %1010 = vmatpush.msrb.mxu3 %v567_v28  ;;  %v313_v28 = vld [vmem:[%s1117_s15 + $0xf8] sm:$0xff] }
  0x2d   : > { %988 = vmatmul.msk.f32.gmra.mxu3 %vm322_vm0, %v310_v7 }
  0x2e   : > { %1011 = vmatpush.msrb.mxu3 %v566_v29  ;;  %v737_v29 = vld [vmem:[%s1469_s5 + $0x40] sm:$0xff] }
  0x30   : > { %1012 = vmatpush.msrb.mxu3 %v565_v31 }
  0x32   : > { %1013 = vmatpush.msrb.mxu3 %v564_v32 }
  0x33   : > { %964 = vmatmul.msk.f32.gmra.mxu0 %vm322_vm0, %v286_v8 }
  0x34   : > { %1014 = vmatpush.msra.mxu3 %v744_v13 }
  0x36   : > { %1015 = vmatpush.msra.mxu3 %v743_v17 }
  0x38   : > { %1016 = vmatpush.msra.mxu3 %v742_v19 }
  0x3b   : > { %965 = vmatmul.msk.f32.gmra.mxu0 %vm322_vm0, %v287_v9  ;;  %v306_v9 = vld [vmem:[%s1117_s15 + $0xc0] sm:$0xff] }
  0x43   : > { %966 = vmatmul.msk.f32.gmra.mxu0 %vm322_vm0, %v288_v10 }
  0x4b   : > { %967 = vmatmul.msk.f32.gmra.mxu0 %vm322_vm0, %v289_v11 }
  0x53   : > { %968 = vmatmul.msk.f32.gmra.mxu0 %vm322_vm0, %v290_v12  ;;  %v311_v12 = vld [vmem:[%s1117_s15 + $0xe8] sm:$0xff]  ;;  %s1348_s15 = scalar_lea.vmem %s1471_s7, %s957_s12 }
  0x54   : > { %989 = vmatmul.msk.f32.gmra.mxu3 %vm322_vm0, %v311_v12 }
  0x5b   : > { %969 = vmatmul.msk.f32.gmra.mxu0 %vm322_vm0, %v291_v16 }
  0x5c   : > { %990 = vmatmul.msk.f32.gmra.mxu3 %vm322_vm0, %v312_v20 }
  0x63   : > { %970 = vmatmul.msk.f32.gmra.mxu0 %vm322_vm0, %v292_v21  ;;  %v741_v21 = vld [vmem:[%s1469_s5 + $0x60] sm:$0xff] }
  0x64   : > { %752 = vmatpush.msra.mxu2 %v741_v21  ;;  %1017 = vmatpush.msra.mxu3 %v741_v21 }
  0x65   : > { %991 = vmatmul.msk.f32.gmra.mxu3 %vm322_vm0, %v313_v28 }
  0x66   : > { %753 = vmatpush.msra.mxu2 %v740_v22  ;;  %1018 = vmatpush.msra.mxu3 %v740_v22 }
  0x68   : > { %754 = vmatpush.msra.mxu2 %v739_v25  ;;  %1019 = vmatpush.msra.mxu3 %v739_v25 }
  0x6a   : > { %755 = vmatpush.msra.mxu2 %v738_v27  ;;  %1020 = vmatpush.msra.mxu3 %v738_v27 }
  0x6b   : > { %971 = vmatmul.msk.f32.gmra.mxu0 %vm322_vm0, %v293_v26 }
  0x6c   : > { %756 = vmatpush.msra.mxu2 %v737_v29  ;;  %1021 = vmatpush.msra.mxu3 %v737_v29 }
  0x73   : > { %972 = vmatmul.msk.f32.gmra.mxu0 %vm322_vm0, %v294_v30  ;;  %v736_v30 = vld [vmem:[%s1469_s5 + $0x38] sm:$0xff] }
  0x74   : > { %757 = vmatpush.msra.mxu2 %v736_v30  ;;  %1022 = vmatpush.msra.mxu3 %v736_v30 }
  0x7b   : > { %973 = vmatmul.msk.f32.gmra.mxu0 %vm322_vm0, %v295_v33  ;;  %v735_v33 = vld [vmem:[%s1469_s5 + $0x30] sm:$0xff] }
  0x7c   : > { %758 = vmatpush.msra.mxu2 %v735_v33  ;;  %1023 = vmatpush.msra.mxu3 %v735_v33 }
  0x83   : > { %974 = vmatmul.msk.f32.gmra.mxu0 %vm322_vm0, %v296_v34 }
  0x8b   : > { %975 = vmatmul.msk.f32.gmra.mxu0 %vm322_vm0, %v297_v35  ;;  %v734_v35 = vld [vmem:[%s1469_s5 + $0x28] sm:$0xff] }
  0x8c   : > { %759 = vmatpush.msra.mxu2 %v734_v35  ;;  %1024 = vmatpush.msra.mxu3 %v734_v35 }
  0x90   : > { %v436_v37 = vpop.f32.mrf.mxu0 }
  0x91   : > { %v437_v39 = vadd.f32 %v1202_v36, %v436_v37  ;;  %v733_v37 = vld [vmem:[%s1469_s5 + $0x20] sm:$0xff] }
  0x92   : > { %760 = vmatpush.msra.mxu2 %v733_v37  ;;  %1025 = vmatpush.msra.mxu3 %v733_v37 }
  0x93   : > { %976 = vmatmul.msk.f32.gmra.mxu0 %vm322_vm0, %v298_v38  ;;  %v532_v40 = vmax.f32 %v437_v39, 0.0  ;;  %v732_v38 = vld [vmem:[%s1469_s5 + $0x18] sm:$0xff] }
  0x94   : > { %761 = vmatpush.msra.mxu2 %v732_v38  ;;  %1026 = vmatpush.msra.mxu3 %v732_v38 }
  0x95   : > { %600 = vmatmul.f32.vlgmr.msra.gmra.mxu1 %v532_v40 }
  0x98   : > { %v439_v41 = vpop.f32.mrf.mxu0 }
  0x99   : > { %v440_v43 = vadd.f32 %v1202_v36, %v439_v41  ;;  %v731_v41 = vld [vmem:[%s1469_s5 + $0x10] sm:$0xff] }
  0x9a   : > { %762 = vmatpush.msra.mxu2 %v731_v41  ;;  %1027 = vmatpush.msra.mxu3 %v731_v41 }
  0x9b   : > { %977 = vmatmul.msk.f32.gmra.mxu0 %vm322_vm0, %v299_v42  ;;  %v533_v44 = vmax.f32 %v440_v43, 0.0  ;;  %v730_v43 = vld [vmem:[%s1469_s5 + $0x8] sm:$0xff] }
  0x9c   : > { %763 = vmatpush.msra.mxu2 %v730_v43  ;;  %1028 = vmatpush.msra.mxu3 %v730_v43 }
  0x9d   : > { %603 = vmatmul.f32.gmra.mxu1 %v533_v44  ;;  %v729_v44 = vld [vmem:[%s1469_s5] sm:$0xff] }
  0x9e   : > { %764 = vmatpush.msra.mxu2 %v729_v44  ;;  %1029 = vmatpush.msra.mxu3 %v729_v44 }
  0xa0   : > { %v442_v45 = vpop.f32.mrf.mxu0  ;;  %v514_v41 = vpop.f32.mrf.mxu3 }
  0xa1   : > { %v443_v47 = vadd.f32 %v1202_v36, %v442_v45 }
  0xa3   : > { %v534_v48 = vmax.f32 %v443_v47, 0.0  ;;  %978 = vmatmul.msk.f32.gmra.mxu0 %vm322_vm0, %v300_v46 }
  0xa5   : > { %606 = vmatmul.f32.gmra.mxu1 %v534_v48 }
  0xa8   : > { %v445_v49 = vpop.f32.mrf.mxu0 }
  0xa9   : > { %v446_v51 = vadd.f32 %v1202_v36, %v445_v49 }
  0xab   : > { %v535_v52 = vmax.f32 %v446_v51, 0.0  ;;  %979 = vmatmul.msk.f32.gmra.mxu0 %vm322_vm0, %v301_v50 }
  0xad   : > { %609 = vmatmul.f32.gmra.mxu1 %v535_v52 }
  0xb0   : > { %v448_v53 = vpop.f32.mrf.mxu0 }
  0xb1   : > { %v449_v55 = vadd.f32 %v1202_v36, %v448_v53 }
  0xb3   : > { %v536_v56 = vmax.f32 %v449_v55, 0.0  ;;  %980 = vmatmul.msk.f32.gmra.mxu0 %vm322_vm0, %v302_v54  ;;  %v1303_v54 = vld [vmem:[%s1468_s4] ss:$0 sm:$0xff] }
  0xb5   : > { %612 = vmatmul.f32.gmra.mxu1 %v536_v56 }
  0xb8   : > { %v451_v57 = vpop.f32.mrf.mxu0 }
  0xb9   : > { %v452_v59 = vadd.f32 %v1202_v36, %v451_v57 }
  0xbb   : > { %v537_v60 = vmax.f32 %v452_v59, 0.0  ;;  %981 = vmatmul.msk.f32.gmra.mxu0 %vm322_vm0, %v303_v58 }
  0xbd   : > { %615 = vmatmul.f32.gmra.mxu1 %v537_v60 }
  0xc0   : > { %v454_v62 = vpop.f32.mrf.mxu0 }
  0xc1   : > { %v455_v0 = vadd.f32 %v1202_v36, %v454_v62 }
  0xc3   : > { %v538_v1 = vmax.f32 %v455_v0, 0.0  ;;  %982 = vmatmul.msk.f32.gmra.mxu0 %vm322_vm0, %v304_v63 }
  0xc5   : > { %618 = vmatmul.f32.gmra.mxu1 %v538_v1 }
  0xc8   : > { %v457_v3 = vpop.f32.mrf.mxu0 }
  0xc9   : > { %v458_v5 = vadd.f32 %v1202_v36, %v457_v3 }
  0xcb   : > { %v539_v6 = vmax.f32 %v458_v5, 0.0  ;;  %983 = vmatmul.msk.f32.gmra.mxu0 %vm322_vm0, %v305_v4 }
  0xcd   : > { %621 = vmatmul.f32.gmra.mxu1 %v539_v6 }
  0xd0   : > { %v460_v8 = vpop.f32.mrf.mxu0 }
  0xd1   : > { %v461_v10 = vadd.f32 %v1202_v36, %v460_v8 }
  0xd3   : > { %v540_v11 = vmax.f32 %v461_v10, 0.0  ;;  %984 = vmatmul.msk.f32.gmra.mxu0 %vm322_vm0, %v306_v9 }
  0xd5   : > { %624 = vmatmul.f32.gmra.mxu1 %v540_v11 }
  0xd8   : > { %v463_v14 = vpop.f32.mrf.mxu0 }
  0xd9   : > { %v464_v16 = vadd.f32 %v1202_v36, %v463_v14 }
  0xdb   : > { %v541_v18 = vmax.f32 %v464_v16, 0.0  ;;  %985 = vmatmul.msk.f32.gmra.mxu0 %vm322_vm0, %v307_v15 }
  0xdd   : > { %627 = vmatmul.f32.gmra.mxu1 %v541_v18 }
  0xe0   : > { %v466_v23 = vpop.f32.mrf.mxu0 }
  0xe1   : > { %v467_v24 = vadd.f32 %v1202_v36, %v466_v23 }
  0xe3   : > { %v542_v26 = vmax.f32 %v467_v24, 0.0 }
  0xe5   : > { %630 = vmatmul.f32.gmra.mxu1 %v542_v26 }
  0xe8   : > { %v469_v31 = vpop.f32.mrf.mxu0 }
  0xe9   : > { %v470_v32 = vadd.f32 %v1202_v36, %v469_v31 }
  0xeb   : > { %v543_v34 = vmax.f32 %v470_v32, 0.0 }
  0xed   : > { %633 = vmatmul.f32.gmra.mxu1 %v543_v34 }
  0xf0   : > { %v472_v39 = vpop.f32.mrf.mxu0 }
  0xf1   : > { %v473_v40 = vadd.f32 %v1202_v36, %v472_v39 }
  0xf3   : > { %v544_v42 = vmax.f32 %v473_v40, 0.0 }
  0xf5   : > { %636 = vmatmul.f32.gmra.mxu1 %v544_v42 }
  0xf8   : > { %v475_v45 = vpop.f32.mrf.mxu0 }
  0xf9   : > { %v476_v46 = vadd.f32 %v1202_v36, %v475_v45 }
  0xfb   : > { %v545_v47 = vmax.f32 %v476_v46, 0.0 }
  0xfd   : > { %639 = vmatmul.f32.gmra.mxu1 %v545_v47 }
 0x100   : > { %v478_v48 = vpop.f32.mrf.mxu0 }
 0x101   : > { %v479_v49 = vadd.f32 %v1202_v36, %v478_v48 }
 0x103   : > { %v546_v50 = vmax.f32 %v479_v49, 0.0 }
 0x105   : > { %642 = vmatmul.f32.gmra.mxu1 %v546_v50  ;;  %v517_v50 = vpop.f32.mrf.mxu3 }
 0x108   : > { %v481_v51 = vpop.f32.mrf.mxu0 }
 0x109   : > { %v482_v52 = vadd.f32 %v1202_v36, %v481_v51 }
 0x10b   : > { %v547_v53 = vmax.f32 %v482_v52, 0.0 }
 0x10d   : > { %645 = vmatmul.f32.gmra.mxu1 %v547_v53 }
 0x110   : > { %v484_v55 = vpop.f32.mrf.mxu0 }
 0x111   : > { %v485_v56 = vadd.f32 %v1202_v36, %v484_v55  ;;  %v515_v55 = vadd.f32 %v1202_v36, %v514_v41 }
 0x112   : > { %v601_v57 = vpop.f32.mrf.mxu1 }
 0x113   : > { %v548_v58 = vmax.f32 %v485_v56, 0.0  ;;  %v602_v59 = vadd.f32 %v1303_v54, %v601_v57  ;;  %v558_v56 = vmax.f32 %v515_v55, 0.0 }
 0x115   : > { %v697_v60 = vmax.f32 %v602_v59, 0.0  ;;  %648 = vmatmul.f32.gmra.mxu1 %v548_v58  ;;  %v520_v59 = vpop.f32.mrf.mxu3 }
 0x117   : > { %765 = vmatmul.f32.vlgmr.msra.gmra.mxu2 %v697_v60 }
 0x118   : > { %v487_v61 = vpop.f32.mrf.mxu0 }
 0x119   : > { %v488_v62 = vadd.f32 %v1202_v36, %v487_v61  ;;  %v518_v61 = vadd.f32 %v1202_v36, %v517_v50 }
 0x11a   : > { %v604_v63 = vpop.f32.mrf.mxu1 }
 0x11b   : > { %v549_v0 = vmax.f32 %v488_v62, 0.0  ;;  %v605_v1 = vadd.f32 %v1303_v54, %v604_v63  ;;  %v559_v62 = vmax.f32 %v518_v61, 0.0 }
 0x11d   : > { %v698_v2 = vmax.f32 %v605_v1, 0.0  ;;  %651 = vmatmul.f32.gmra.mxu1 %v549_v0 }
 0x11f   : > { %768 = vmatmul.f32.gmra.mxu2 %v698_v2  ;;  %v521_v2 = vadd.f32 %v1202_v36, %v520_v59 }
 0x120   : > { %v490_v3 = vpop.f32.mrf.mxu0 }
 0x121   : > { %v491_v4 = vadd.f32 %v1202_v36, %v490_v3  ;;  %v523_v3 = vpop.f32.mrf.mxu3 }
 0x122   : > { %v607_v5 = vpop.f32.mrf.mxu1 }
 0x123   : > { %v550_v6 = vmax.f32 %v491_v4, 0.0  ;;  %v608_v7 = vadd.f32 %v1303_v54, %v607_v5  ;;  %v560_v4 = vmax.f32 %v521_v2, 0.0 }
 0x125   : > { %v699_v8 = vmax.f32 %v608_v7, 0.0  ;;  %654 = vmatmul.f32.gmra.mxu1 %v550_v6 }
 0x127   : > { %771 = vmatmul.f32.gmra.mxu2 %v699_v8  ;;  %v524_v8 = vadd.f32 %v1202_v36, %v523_v3 }
 0x128   : > { %v493_v9 = vpop.f32.mrf.mxu0 }
 0x129   : > { %v494_v10 = vadd.f32 %v1202_v36, %v493_v9  ;;  %v526_v9 = vpop.f32.mrf.mxu3 }
 0x12a   : > { %v610_v11 = vpop.f32.mrf.mxu1 }
 0x12b   : > { %v551_v12 = vmax.f32 %v494_v10, 0.0  ;;  %v611_v13 = vadd.f32 %v1303_v54, %v610_v11  ;;  %v561_v10 = vmax.f32 %v524_v8, 0.0 }
 0x12d   : > { %v700_v14 = vmax.f32 %v611_v13, 0.0  ;;  %657 = vmatmul.f32.gmra.mxu1 %v551_v12 }
 0x12f   : > { %774 = vmatmul.f32.gmra.mxu2 %v700_v14  ;;  %v527_v14 = vadd.f32 %v1202_v36, %v526_v9 }
 0x130   : > { %v496_v15 = vpop.f32.mrf.mxu0 }
 0x131   : > { %v497_v16 = vadd.f32 %v1202_v36, %v496_v15  ;;  %v562_v15 = vmax.f32 %v527_v14, 0.0 }
 0x132   : > { %v613_v17 = vpop.f32.mrf.mxu1 }
 0x133   : > { %v552_v18 = vmax.f32 %v497_v16, 0.0  ;;  %v614_v19 = vadd.f32 %v1303_v54, %v613_v17  ;;  %v529_v17 = vpop.f32.mrf.mxu3 }
 0x135   : > { %v701_v20 = vmax.f32 %v614_v19, 0.0  ;;  %660 = vmatmul.f32.gmra.mxu1 %v552_v18 }
 0x137   : > { %777 = vmatmul.f32.gmra.mxu2 %v701_v20  ;;  %v530_v20 = vadd.f32 %v1202_v36, %v529_v17 }
 0x138   : > { %v499_v21 = vpop.f32.mrf.mxu0 }
 0x139   : > { %v500_v22 = vadd.f32 %v1202_v36, %v499_v21  ;;  %v563_v21 = vmax.f32 %v530_v20, 0.0 }
 0x13a   : > { %v616_v23 = vpop.f32.mrf.mxu1 }
 0x13b   : > { %v553_v24 = vmax.f32 %v500_v22, 0.0  ;;  %v617_v25 = vadd.f32 %v1303_v54, %v616_v23 }
 0x13d   : > { %v702_v26 = vmax.f32 %v617_v25, 0.0  ;;  %663 = vmatmul.f32.gmra.mxu1 %v553_v24 }
 0x13f   : > { %780 = vmatmul.f32.gmra.mxu2 %v702_v26 }
 0x140   : > { %v502_v27 = vpop.f32.mrf.mxu0 }
 0x141   : > { %v503_v28 = vadd.f32 %v1202_v36, %v502_v27 }
 0x142   : > { %v619_v29 = vpop.f32.mrf.mxu1 }
 0x143   : > { %v554_v30 = vmax.f32 %v503_v28, 0.0  ;;  %v620_v31 = vadd.f32 %v1303_v54, %v619_v29  ;;  %v1341_v28 = vld [vmem:[%s1470_s6] ss:$0 sm:$0xff] }
 0x145   : > { %v703_v32 = vmax.f32 %v620_v31, 0.0  ;;  %666 = vmatmul.f32.gmra.mxu1 %v554_v30 }
 0x147   : > { %783 = vmatmul.f32.gmra.mxu2 %v703_v32 }
 0x148   : > { %v505_v33 = vpop.f32.mrf.mxu0 }
 0x149   : > { %v506_v34 = vadd.f32 %v1202_v36, %v505_v33 }
 0x14a   : > { %v622_v35 = vpop.f32.mrf.mxu1 }
 0x14b   : > { %v555_v37 = vmax.f32 %v506_v34, 0.0  ;;  %v623_v38 = vadd.f32 %v1303_v54, %v622_v35 }
 0x14d   : > { %v704_v39 = vmax.f32 %v623_v38, 0.0  ;;  %669 = vmatmul.f32.gmra.mxu1 %v555_v37 }
 0x14f   : > { %786 = vmatmul.f32.gmra.mxu2 %v704_v39 }
 0x150   : > { %v508_v40 = vpop.f32.mrf.mxu0 }
 0x151   : > { %v509_v42 = vadd.f32 %v1202_v36, %v508_v40 }
 0x152   : > { %v625_v43 = vpop.f32.mrf.mxu1 }
 0x153   : > { %v556_v44 = vmax.f32 %v509_v42, 0.0  ;;  %v626_v45 = vadd.f32 %v1303_v54, %v625_v43 }
 0x155   : > { %v705_v46 = vmax.f32 %v626_v45, 0.0  ;;  %672 = vmatmul.f32.vlgmr.msrb.gmra.mxu3 %v556_v44 }
 0x157   : > { %789 = vmatmul.f32.gmra.mxu2 %v705_v46 }
 0x158   : > { %v511_v47 = vpop.f32.mrf.mxu0 }
 0x159   : > { %v512_v48 = vadd.f32 %v1202_v36, %v511_v47 }
 0x15a   : > { %v628_v49 = vpop.f32.mrf.mxu1 }
 0x15b   : > { %v557_v51 = vmax.f32 %v512_v48, 0.0  ;;  %v629_v52 = vadd.f32 %v1303_v54, %v628_v49 }
 0x15d   : > { %v706_v53 = vmax.f32 %v629_v52, 0.0  ;;  %675 = vmatmul.f32.gmra.mxu3 %v557_v51 }
 0x15f   : > { %792 = vmatmul.f32.gmra.mxu2 %v706_v53 }
 0x162   : > { %v631_v57 = vpop.f32.mrf.mxu1 }
 0x163   : > { %v632_v58 = vadd.f32 %v1303_v54, %v631_v57 }
 0x165   : > { %v707_v60 = vmax.f32 %v632_v58, 0.0  ;;  %678 = vmatmul.f32.gmra.mxu3 %v558_v56 }
 0x167   : > { %795 = vmatmul.f32.gmra.mxu2 %v707_v60 }
 0x16a   : > { %v634_v63 = vpop.f32.mrf.mxu1 }
 0x16b   : > { %v635_v0 = vadd.f32 %v1303_v54, %v634_v63 }
 0x16d   : > { %v708_v1 = vmax.f32 %v635_v0, 0.0  ;;  %681 = vmatmul.f32.gmra.mxu3 %v559_v62 }
 0x16f   : > { %798 = vmatmul.f32.gmra.mxu2 %v708_v1 }
 0x172   : > { %v637_v5 = vpop.f32.mrf.mxu1 }
 0x173   : > { %v638_v6 = vadd.f32 %v1303_v54, %v637_v5 }
 0x175   : > { %v709_v7 = vmax.f32 %v638_v6, 0.0  ;;  %684 = vmatmul.f32.gmra.mxu3 %v560_v4 }
 0x177   : > { %801 = vmatmul.f32.gmra.mxu2 %v709_v7 }
 0x17a   : > { %v640_v11 = vpop.f32.mrf.mxu1 }
 0x17b   : > { %v641_v12 = vadd.f32 %v1303_v54, %v640_v11 }
 0x17d   : > { %v710_v13 = vmax.f32 %v641_v12, 0.0  ;;  %687 = vmatmul.f32.gmra.mxu3 %v561_v10 }
 0x17f   : > { %804 = vmatmul.f32.gmra.mxu2 %v710_v13 }
 0x182   : > { %v643_v16 = vpop.f32.mrf.mxu1 }
 0x183   : > { %v644_v18 = vadd.f32 %v1303_v54, %v643_v16 }
 0x185   : > { %v711_v19 = vmax.f32 %v644_v18, 0.0  ;;  %690 = vmatmul.f32.gmra.mxu3 %v562_v15 }
 0x187   : > { %807 = vmatmul.f32.gmra.mxu2 %v711_v19 }
 0x18a   : > { %v646_v22 = vpop.f32.mrf.mxu1 }
 0x18b   : > { %v647_v23 = vadd.f32 %v1303_v54, %v646_v22 }
 0x18d   : > { %v712_v24 = vmax.f32 %v647_v23, 0.0  ;;  %693 = vmatmul.f32.gmra.mxu3 %v563_v21 }
 0x18f   : > { %810 = vmatmul.f32.gmra.mxu2 %v712_v24 }
 0x192   : > { %v649_v25 = vpop.f32.mrf.mxu1 }
 0x193   : > { %v650_v26 = vadd.f32 %v1303_v54, %v649_v25 }
 0x195   : > { %v713_v27 = vmax.f32 %v650_v26, 0.0 }
 0x197   : > { %813 = vmatmul.f32.gmra.mxu2 %v713_v27 }
 0x19a   : > { %v652_v29 = vpop.f32.mrf.mxu1  ;;  %v766_v36 = vpop.f32.mrf.mxu2 }
 0x19b   : > { %v653_v30 = vadd.f32 %v1303_v54, %v652_v29  ;;  %v767_v31 = vadd.f32 %v1341_v28, %v766_v36 }
 0x19d   : > { %v714_v32 = vmax.f32 %v653_v30, 0.0  ;;  %863 = vst.msk [vmem:[%s1348_s15] sm:$0xff] %vm862_vm1, %v767_v31 }
 0x19f   : > { %816 = vmatmul.f32.gmra.mxu2 %v714_v32 }
 0x1a2   : > { %v655_v33 = vpop.f32.mrf.mxu1  ;;  %v769_v34 = vpop.f32.mrf.mxu2 }
 0x1a3   : > { %v656_v35 = vadd.f32 %v1303_v54, %v655_v33  ;;  %v770_v37 = vadd.f32 %v1341_v28, %v769_v34 }
 0x1a5   : > { %v715_v38 = vmax.f32 %v656_v35, 0.0  ;;  %864 = vst.msk [vmem:[%s1348_s15 + $0x8] sm:$0xff] %vm862_vm1, %v770_v37 }
 0x1a7   : > { %819 = vmatmul.f32.gmra.mxu2 %v715_v38 }
 0x1aa   : > { %v658_v39 = vpop.f32.mrf.mxu1  ;;  %v772_v40 = vpop.f32.mrf.mxu2 }
 0x1ab   : > { %v659_v41 = vadd.f32 %v1303_v54, %v658_v39  ;;  %v773_v42 = vadd.f32 %v1341_v28, %v772_v40 }
 0x1ad   : > { %v716_v43 = vmax.f32 %v659_v41, 0.0  ;;  %865 = vst.msk [vmem:[%s1348_s15 + $0x10] sm:$0xff] %vm862_vm1, %v773_v42 }
 0x1af   : > { %822 = vmatmul.f32.gmra.mxu2 %v716_v43 }
 0x1b2   : > { %v661_v44 = vpop.f32.mrf.mxu1  ;;  %v775_v45 = vpop.f32.mrf.mxu2 }
 0x1b3   : > { %v662_v46 = vadd.f32 %v1303_v54, %v661_v44  ;;  %v776_v47 = vadd.f32 %v1341_v28, %v775_v45 }
 0x1b5   : > { %v717_v48 = vmax.f32 %v662_v46, 0.0  ;;  %866 = vst.msk [vmem:[%s1348_s15 + $0x18] sm:$0xff] %vm862_vm1, %v776_v47 }
 0x1b7   : > { %825 = vmatmul.f32.gmra.mxu2 %v717_v48 }
 0x1ba   : > { %v664_v49 = vpop.f32.mrf.mxu1  ;;  %v778_v50 = vpop.f32.mrf.mxu2 }
 0x1bb   : > { %v665_v51 = vadd.f32 %v1303_v54, %v664_v49  ;;  %v779_v52 = vadd.f32 %v1341_v28, %v778_v50 }
 0x1bd   : > { %v718_v53 = vmax.f32 %v665_v51, 0.0  ;;  %867 = vst.msk [vmem:[%s1348_s15 + $0x20] sm:$0xff] %vm862_vm1, %v779_v52 }
 0x1bf   : > { %828 = vmatmul.f32.gmra.mxu2 %v718_v53 }
 0x1c2   : > { %v667_v55 = vpop.f32.mrf.mxu1  ;;  %v781_v56 = vpop.f32.mrf.mxu2 }
 0x1c3   : > { %v668_v57 = vadd.f32 %v1303_v54, %v667_v55  ;;  %v782_v58 = vadd.f32 %v1341_v28, %v781_v56 }
 0x1c5   : > { %v719_v59 = vmax.f32 %v668_v57, 0.0  ;;  %868 = vst.msk [vmem:[%s1348_s15 + $0x28] sm:$0xff] %vm862_vm1, %v782_v58 }
 0x1c7   : > { %831 = vmatmul.f32.gmra.mxu2 %v719_v59 }
 0x1ca   : > { %v670_v60 = vpop.f32.mrf.mxu1  ;;  %v784_v61 = vpop.f32.mrf.mxu2 }
 0x1cb   : > { %v671_v62 = vadd.f32 %v1303_v54, %v670_v60  ;;  %v785_v63 = vadd.f32 %v1341_v28, %v784_v61 }
 0x1cd   : > { %v720_v0 = vmax.f32 %v671_v62, 0.0  ;;  %869 = vst.msk [vmem:[%s1348_s15 + $0x30] sm:$0xff] %vm862_vm1, %v785_v63 }
 0x1cf   : > { %834 = vmatmul.f32.gmra.mxu2 %v720_v0 }
 0x1d2   : > { %v787_v1 = vpop.f32.mrf.mxu2 }
 0x1d3   : > { %v788_v2 = vadd.f32 %v1341_v28, %v787_v1 }
 0x1d5   : > { %870 = vst.msk [vmem:[%s1348_s15 + $0x38] sm:$0xff] %vm862_vm1, %v788_v2 }
 0x1d8   : > { %v673_v3 = vpop.f32.mrf.mxu3 }
 0x1d9   : > { %v674_v4 = vadd.f32 %v1303_v54, %v673_v3 }
 0x1da   : > { %v790_v5 = vpop.f32.mrf.mxu2 }
 0x1db   : > { %v721_v6 = vmax.f32 %v674_v4, 0.0  ;;  %v791_v7 = vadd.f32 %v1341_v28, %v790_v5 }
 0x1dd   : > { %871 = vst.msk [vmem:[%s1348_s15 + $0x40] sm:$0xff] %vm862_vm1, %v791_v7  ;;  %837 = vmatmul.f32.vlgmr.msra.gmra.mxu3 %v721_v6 }
 0x1e0   : > { %v676_v8 = vpop.f32.mrf.mxu3 }
 0x1e1   : > { %v677_v9 = vadd.f32 %v1303_v54, %v676_v8 }
 0x1e2   : > { %v793_v10 = vpop.f32.mrf.mxu2 }
 0x1e3   : > { %v722_v11 = vmax.f32 %v677_v9, 0.0  ;;  %v794_v12 = vadd.f32 %v1341_v28, %v793_v10 }
 0x1e5   : > { %872 = vst.msk [vmem:[%s1348_s15 + $0x48] sm:$0xff] %vm862_vm1, %v794_v12  ;;  %840 = vmatmul.f32.gmra.mxu3 %v722_v11 }
 0x1e8   : > { %v679_v13 = vpop.f32.mrf.mxu3 }
 0x1e9   : > { %v680_v14 = vadd.f32 %v1303_v54, %v679_v13 }
 0x1ea   : > { %v796_v15 = vpop.f32.mrf.mxu2 }
 0x1eb   : > { %v723_v16 = vmax.f32 %v680_v14, 0.0  ;;  %v797_v17 = vadd.f32 %v1341_v28, %v796_v15 }
 0x1ed   : > { %873 = vst.msk [vmem:[%s1348_s15 + $0x50] sm:$0xff] %vm862_vm1, %v797_v17  ;;  %843 = vmatmul.f32.gmra.mxu3 %v723_v16 }
 0x1f0   : > { %v682_v18 = vpop.f32.mrf.mxu3 }
 0x1f1   : > { %v683_v19 = vadd.f32 %v1303_v54, %v682_v18 }
 0x1f2   : > { %v799_v20 = vpop.f32.mrf.mxu2 }
 0x1f3   : > { %v724_v21 = vmax.f32 %v683_v19, 0.0  ;;  %v800_v22 = vadd.f32 %v1341_v28, %v799_v20 }
 0x1f5   : > { %874 = vst.msk [vmem:[%s1348_s15 + $0x58] sm:$0xff] %vm862_vm1, %v800_v22  ;;  %846 = vmatmul.f32.gmra.mxu3 %v724_v21 }
 0x1f8   : > { %v685_v23 = vpop.f32.mrf.mxu3 }
 0x1f9   : > { %v686_v24 = vadd.f32 %v1303_v54, %v685_v23 }
 0x1fa   : > { %v802_v25 = vpop.f32.mrf.mxu2 }
 0x1fb   : > { %v725_v26 = vmax.f32 %v686_v24, 0.0  ;;  %v803_v27 = vadd.f32 %v1341_v28, %v802_v25 }
 0x1fd   : > { %875 = vst.msk [vmem:[%s1348_s15 + $0x60] sm:$0xff] %vm862_vm1, %v803_v27  ;;  %849 = vmatmul.f32.gmra.mxu3 %v725_v26 }
 0x200   : > { %v688_v29 = vpop.f32.mrf.mxu3 }
 0x201   : > { %v689_v36 = vadd.f32 %v1303_v54, %v688_v29 }
 0x202   : > { %v805_v30 = vpop.f32.mrf.mxu2 }
 0x203   : > { %v726_v31 = vmax.f32 %v689_v36, 0.0  ;;  %v806_v32 = vadd.f32 %v1341_v28, %v805_v30 }
 0x205   : > { %876 = vst.msk [vmem:[%s1348_s15 + $0x68] sm:$0xff] %vm862_vm1, %v806_v32  ;;  %852 = vmatmul.f32.gmra.mxu3 %v726_v31 }
 0x208   : > { %v691_v33 = vpop.f32.mrf.mxu3 }
 0x209   : > { %v692_v34 = vadd.f32 %v1303_v54, %v691_v33 }
 0x20a   : > { %v808_v35 = vpop.f32.mrf.mxu2 }
 0x20b   : > { %v727_v37 = vmax.f32 %v692_v34, 0.0  ;;  %v809_v38 = vadd.f32 %v1341_v28, %v808_v35 }
 0x20d   : > { %877 = vst.msk [vmem:[%s1348_s15 + $0x70] sm:$0xff] %vm862_vm1, %v809_v38  ;;  %855 = vmatmul.f32.gmra.mxu3 %v727_v37 }
 0x210   : > { %v694_v39 = vpop.f32.mrf.mxu3 }
 0x211   : > { %v695_v40 = vadd.f32 %v1303_v54, %v694_v39 }
 0x212   : > { %v811_v41 = vpop.f32.mrf.mxu2 }
 0x213   : > { %v728_v42 = vmax.f32 %v695_v40, 0.0  ;;  %v812_v43 = vadd.f32 %v1341_v28, %v811_v41 }
 0x215   : > { %878 = vst.msk [vmem:[%s1348_s15 + $0x78] sm:$0xff] %vm862_vm1, %v812_v43  ;;  %858 = vmatmul.f32.gmra.mxu3 %v728_v42 }
 0x21a   : > { %v814_v44 = vpop.f32.mrf.mxu2 }
 0x21b   : > { %v815_v45 = vadd.f32 %v1341_v28, %v814_v44 }
 0x21d   : > { %879 = vst.msk [vmem:[%s1348_s15 + $0x80] sm:$0xff] %vm862_vm1, %v815_v45 }
 0x222   : > { %v817_v46 = vpop.f32.mrf.mxu2 }
 0x223   : > { %v818_v47 = vadd.f32 %v1341_v28, %v817_v46 }
 0x225   : > { %880 = vst.msk [vmem:[%s1348_s15 + $0x88] sm:$0xff] %vm862_vm1, %v818_v47 }
 0x22a   : > { %v820_v54 = vpop.f32.mrf.mxu2 }
 0x22b   : > { %v821_v48 = vadd.f32 %v1341_v28, %v820_v54 }
 0x22d   : > { %881 = vst.msk [vmem:[%s1348_s15 + $0x90] sm:$0xff] %vm862_vm1, %v821_v48 }
 0x232   : > { %v823_v49 = vpop.f32.mrf.mxu2 }
 0x233   : > { %v824_v50 = vadd.f32 %v1341_v28, %v823_v49 }
 0x235   : > { %882 = vst.msk [vmem:[%s1348_s15 + $0x98] sm:$0xff] %vm862_vm1, %v824_v50 }
 0x23a   : > { %v826_v51 = vpop.f32.mrf.mxu2 }
 0x23b   : > { %v827_v52 = vadd.f32 %v1341_v28, %v826_v51 }
 0x23d   : > { %883 = vst.msk [vmem:[%s1348_s15 + $0xa0] sm:$0xff] %vm862_vm1, %v827_v52 }
 0x242   : > { %v829_v53 = vpop.f32.mrf.mxu2 }
 0x243   : > { %v830_v55 = vadd.f32 %v1341_v28, %v829_v53 }
 0x245   : > { %884 = vst.msk [vmem:[%s1348_s15 + $0xa8] sm:$0xff] %vm862_vm1, %v830_v55 }
 0x24a   : > { %v832_v56 = vpop.f32.mrf.mxu2 }
 0x24b   : > { %v833_v57 = vadd.f32 %v1341_v28, %v832_v56 }
 0x24d   : > { %885 = vst.msk [vmem:[%s1348_s15 + $0xb0] sm:$0xff] %vm862_vm1, %v833_v57 }
 0x252   : > { %v835_v58 = vpop.f32.mrf.mxu2 }
 0x253   : > { %v836_v59 = vadd.f32 %v1341_v28, %v835_v58 }
 0x255   : > { %886 = vst.msk [vmem:[%s1348_s15 + $0xb8] sm:$0xff] %vm862_vm1, %v836_v59 }
 0x260   : > { %v838_v60 = vpop.f32.mrf.mxu3 }
 0x261   : > { %v839_v61 = vadd.f32 %v1341_v28, %v838_v60 }
 0x263   : > { %887 = vst.msk [vmem:[%s1348_s15 + $0xc0] sm:$0xff] %vm862_vm1, %v839_v61 }
 0x268   : > { %v841_v62 = vpop.f32.mrf.mxu3 }
 0x269   : > { %v842_v63 = vadd.f32 %v1341_v28, %v841_v62 }
 0x26b   : > { %888 = vst.msk [vmem:[%s1348_s15 + $0xc8] sm:$0xff] %vm862_vm1, %v842_v63 }
 0x270   : > { %v844_v0 = vpop.f32.mrf.mxu3 }
 0x271   : > { %v845_v1 = vadd.f32 %v1341_v28, %v844_v0 }
 0x273   : > { %889 = vst.msk [vmem:[%s1348_s15 + $0xd0] sm:$0xff] %vm862_vm1, %v845_v1 }
 0x278   : > { %v847_v2 = vpop.f32.mrf.mxu3 }
 0x279   : > { %v848_v3 = vadd.f32 %v1341_v28, %v847_v2 }
 0x27b   : > { %890 = vst.msk [vmem:[%s1348_s15 + $0xd8] sm:$0xff] %vm862_vm1, %v848_v3 }
 0x280   : > { %v850_v4 = vpop.f32.mrf.mxu3 }
 0x281   : > { %v851_v5 = vadd.f32 %v1341_v28, %v850_v4 }
 0x283   : > { %891 = vst.msk [vmem:[%s1348_s15 + $0xe0] sm:$0xff] %vm862_vm1, %v851_v5 }
 0x288   : > { %v853_v6 = vpop.f32.mrf.mxu3 }
 0x289   : > { %v854_v7 = vadd.f32 %v1341_v28, %v853_v6 }
 0x28b   : > { %892 = vst.msk [vmem:[%s1348_s15 + $0xe8] sm:$0xff] %vm862_vm1, %v854_v7 }
 0x290   : > { %v856_v8 = vpop.f32.mrf.mxu3 }
 0x291   : > { %v857_v9 = vadd.f32 %v1341_v28, %v856_v8 }
 0x293   : > { %893 = vst.msk [vmem:[%s1348_s15 + $0xf0] sm:$0xff] %vm862_vm1, %v857_v9 }
 0x298   : > { %v859_v10 = vpop.f32.mrf.mxu3 }
 0x299   : > { %v860_v11 = vadd.f32 %v1341_v28, %v859_v10 }
 0x29b   : > { %894 = vst.msk [vmem:[%s1348_s15 + $0xf8] sm:$0xff] %vm862_vm1, %v860_v11 }
 0x29c PF: > { %s17_s24 = sadd.s32 1, %s1047_s24  }
 0x29d   : > { %p14_p4 = scmp.ge.s32.totalorder %s17_s24, 4  }
 0x29f   :  { %16 = sbr.rel (!%p14_p4) target bundleno = 1 (0x1), region = 78 }

</bundles_post_ra>
